<compile_context>
chip_gen: v6e
topology: v6e:2x2x1
jax: 0.10.0
libtpu: 0.0.40
codegen_flags: <defaults>
</compile_context>

<pallas_src>
import functools

import jax
import jax.numpy as jnp
from jax.experimental import pallas as pl
from jax.experimental.pallas import tpu as pltpu


def _round_up(v: int, m: int) -> int:
    return ((v + m - 1) // m) * m


def _default_vmem_limit_bytes() -> int:
    # ~96 MiB on v5e/v6e (128 MiB physical), ~48 MiB on v7x (64 MiB physical).
    try:
        cap = pltpu.get_tpu_info().vmem_capacity_bytes
    except Exception:
        cap = 64 * 1024 * 1024
    return int(min(cap * 3 // 4, 100 * 1024 * 1024))


_VMEM_LIMIT_BYTES = _default_vmem_limit_bytes()


def _mlp_kernel(x_ref, w1_ref, b1_ref, w2_ref, b2_ref, w3_ref, b3_ref, o_ref):
    # x tile arrives f32 straight from HBM; cast to bf16 only at the MXU operand.
    x = x_ref[...].astype(w1_ref.dtype)                                   # (TB, D) bf16

    # fc1 + ReLU : MXU matmul with f32 accumulation, elementwise in f32.
    h1 = jnp.dot(x, w1_ref[...], preferred_element_type=jnp.float32)      # (TB, Hp)
    h1 = jnp.maximum(h1 + b1_ref[...], 0.0)

    # fc2 + ReLU : cast the activation to bf16 only at the MXU operand.
    h2 = jnp.dot(h1.astype(w2_ref.dtype), w2_ref[...],
                 preferred_element_type=jnp.float32)                       # (TB, Hp)
    h2 = jnp.maximum(h2 + b2_ref[...], 0.0)

    # fc3 (H -> 1) + sigmoid : VPU multiply + XLU lane-reduce, no N=1 MXU pass.
    w3_row = w3_ref[...].astype(jnp.float32)                               # (1, Hp)
    z = jnp.sum(h2 * w3_row, axis=-1, keepdims=True)                       # (TB, 1)
    z = z + b3_ref[0, 0]                                                   # scalar bias (SMEM)
    o_ref[...] = jax.nn.sigmoid(z)


def prepare_params(params, *, lane=128):
    """One-time layout prep (call OUTSIDE the hot path).

    Pads hidden_size to a lane multiple with zero rows/cols (exact no-op on the
    math) and pre-casts matmul weights to bf16.  Weights are (in, out) so
    y = x @ W + b matches PyTorch nn.Linear.
    """
    w1, b1, w2, b2, w3, b3 = params
    D, H = w1.shape
    Hp = _round_up(H, lane)
    ph = Hp - H
    w1p = jnp.pad(w1, ((0, 0), (0, ph))).astype(jnp.bfloat16)              # (D, Hp)
    b1p = jnp.pad(b1, ((0, 0), (0, ph)))                                   # (1, Hp) f32
    w2p = jnp.pad(w2, ((0, ph), (0, ph))).astype(jnp.bfloat16)             # (Hp, Hp)
    b2p = jnp.pad(b2, ((0, 0), (0, ph)))                                   # (1, Hp) f32
    w3p = jnp.pad(w3.reshape(1, H), ((0, 0), (0, ph))).astype(jnp.bfloat16)  # (1, Hp)
    b3p = jnp.asarray(b3, jnp.float32).reshape(1, 1)                       # (1, 1) -> SMEM
    return (w1p, b1p, w2p, b2p, w3p, b3p)


@functools.partial(jax.jit, static_argnames=("block_b",))
def patient_classification_net(x, prepared_params, *, block_b=1024):
    """x: (B, input_dim) float32 -> (B, 1) float32 in (0, 1)."""
    w1, b1, w2, b2, w3_row, b3 = prepared_params
    B, D = x.shape
    if w1.shape[0] != D:
        raise ValueError("x feature dim must match prepared w1 fan_in")
    Hp = w1.shape[1]

    # Batch tile: multiple of 16, and sized so the 1-D grid has >= 2 steps
    # whenever B allows (both v7x TensorCores get work).
    TB = int(min(block_b, max(16, _round_up(int(pl.cdiv(B, 2)), 16))))
    grid = (int(pl.cdiv(B, TB)),)   # no wrapper-side pad of x; last block is masked

    # Grid-invariant operands: single-buffered, VMEM-resident.
    def const_spec(shape):
        return pl.BlockSpec(shape, lambda i: (0, 0), pipeline_mode=pl.Buffered(1))

    out = pl.pallas_call(
        _mlp_kernel,
        out_shape=jax.ShapeDtypeStruct((B, 1), jnp.float32),
        grid_spec=pltpu.PrefetchScalarGridSpec(
            num_scalar_prefetch=0,
            grid=grid,
            in_specs=[
                pl.BlockSpec((TB, D), lambda i: (i, 0)),            # x tile (pipelined)
                const_spec((D, Hp)),                                # w1
                const_spec((1, Hp)),                                # b1
                const_spec((Hp, Hp)),                               # w2
                const_spec((1, Hp)),                                # b2
                const_spec((1, Hp)),                                # w3 (as a row)
                pl.BlockSpec(memory_space=pltpu.MemorySpace.SMEM),  # b3 scalar
            ],
            out_specs=pl.BlockSpec((TB, 1), lambda i: (i, 0)),
        ),
        compiler_params=pltpu.CompilerParams(
            dimension_semantics=("parallel",),     # shard batch steps across v7x's 2 TCs
            vmem_limit_bytes=_VMEM_LIMIT_BYTES,    # per-chip budget with headroom
        ),
    )(x, w1, b1, w2, b2, w3_row, b3)

    return out


def init_params(key, input_dim, hidden_size):
    """Deterministic init mimicking nn.Linear's U(-1/sqrt(fan_in), 1/sqrt(fan_in)).

    Weights are stored (in_features, out_features) so y = x @ W + b matches
    PyTorch's nn.Linear (which stores W as (out, in) and computes x @ W.T).
    """
    ks = jax.random.split(key, 6)

    def lin(kw, kb, fan_in, fan_out):
        bound = 1.0 / jnp.sqrt(float(fan_in))
        w = jax.random.uniform(kw, (fan_in, fan_out), jnp.float32, -bound, bound)
        b = jax.random.uniform(kb, (1, fan_out), jnp.float32, -bound, bound)
        return w, b

    w1, b1 = lin(ks[0], ks[1], input_dim, hidden_size)
    w2, b2 = lin(ks[2], ks[3], hidden_size, hidden_size)
    w3, b3 = lin(ks[4], ks[5], hidden_size, 1)
    return (w1, b1, w2, b2, w3, b3)


def _reference_f32(x, params):
    w1, b1, w2, b2, w3, b3 = params
    h1 = jnp.maximum(x @ w1 + b1, 0.0)
    h2 = jnp.maximum(h1 @ w2 + b2, 0.0)
    return jax.nn.sigmoid(h2 @ w3 + b3)


if __name__ == "__main__":
    key = jax.random.PRNGKey(0)
    k_x, k_p = jax.random.split(key)

    batch, input_dim, hidden_size = 10, 16, 32   # B not a multiple of 16: exercises masking
    x = jax.random.normal(k_x, (batch, input_dim), dtype=jnp.float32)
    params = init_params(k_p, input_dim, hidden_size)
    prepared = prepare_params(params)            # pads H -> 128, bf16 weights (one-time)

    out = patient_classification_net(x, prepared)
    out = jax.block_until_ready(out)

    ref = _reference_f32(x, params)
    assert out.shape == (batch, 1), out.shape
    # bf16 MXU operands vs fp32 reference: sigmoid outputs agree to ~1e-3.
    assert jnp.allclose(out, ref, atol=2e-2, rtol=2e-2), float(jnp.max(jnp.abs(out - ref)))
    assert bool(jnp.all((out > 0.0) & (out < 1.0)))

    print("KERNEL_OK")
</pallas_src>

<mosaic_0001>
module attributes {stable_mosaic.version = 11 : i64} {
  func.func @_mlp_kernel(%arg0: i32, %arg1: memref<16x16xf32, #tpu.memory_space<vmem>>, %arg2: memref<16x128xbf16, #tpu.memory_space<vmem>>, %arg3: memref<1x128xf32, #tpu.memory_space<vmem>>, %arg4: memref<128x128xbf16, #tpu.memory_space<vmem>>, %arg5: memref<1x128xf32, #tpu.memory_space<vmem>>, %arg6: memref<1x128xbf16, #tpu.memory_space<vmem>>, %arg7: memref<1x1xf32, #tpu.memory_space<smem>>, %arg8: memref<16x1xf32, #tpu.memory_space<vmem>>) attributes {dimension_semantics = [#tpu.dimension_semantics<parallel>], iteration_bounds = array<i64: 1>, scalar_prefetch = 0 : i64, scratch_operands = 0 : i64, tpu.core_type = #tpu.core_type<tc>, window_params = [{transform_indices = @transform_0, window_bounds = array<i64: 16, 16>}, {pipeline_mode = #tpu.pipeline_mode<synchronous>, transform_indices = @transform_1, window_bounds = array<i64: 16, 128>}, {pipeline_mode = #tpu.pipeline_mode<synchronous>, transform_indices = @transform_2, window_bounds = array<i64: 1, 128>}, {pipeline_mode = #tpu.pipeline_mode<synchronous>, transform_indices = @transform_3, window_bounds = array<i64: 128, 128>}, {pipeline_mode = #tpu.pipeline_mode<synchronous>, transform_indices = @transform_4, window_bounds = array<i64: 1, 128>}, {pipeline_mode = #tpu.pipeline_mode<synchronous>, transform_indices = @transform_5, window_bounds = array<i64: 1, 128>}, {transform_indices = @transform_6, window_bounds = array<i64: 1, 1>}, {transform_indices = @transform_7, window_bounds = array<i64: 16, 1>}]} {
    %c0 = arith.constant 0 : index
    %c0_0 = arith.constant 0 : index
    %0 = vector.load %arg1[%c0, %c0_0] : memref<16x16xf32, #tpu.memory_space<vmem>>, vector<16x16xf32>
    %1 = arith.truncf %0 : vector<16x16xf32> to vector<16x16xbf16>
    %c0_1 = arith.constant 0 : index
    %c0_2 = arith.constant 0 : index
    %2 = vector.load %arg2[%c0_1, %c0_2] : memref<16x128xbf16, #tpu.memory_space<vmem>>, vector<16x128xbf16>
    %cst = arith.constant dense<0.000000e+00> : vector<16x128xf32>
    %3 = tpu.matmul %1, %2, %cst {dimension_numbers = #tpu.dot_dimension_numbers<[1], [0], [0], [1], [0, 0, 1, 1], [], []>} : vector<16x16xbf16>, vector<16x128xbf16>, vector<16x128xf32> -> vector<16x128xf32>
    %c0_3 = arith.constant 0 : index
    %c0_4 = arith.constant 0 : index
    %4 = vector.load %arg3[%c0_3, %c0_4] : memref<1x128xf32, #tpu.memory_space<vmem>>, vector<1x128xf32>
    %5 = vector.broadcast %4 : vector<1x128xf32> to vector<16x128xf32>
    %6 = arith.addf %3, %5 : vector<16x128xf32>
    %cst_5 = arith.constant 0.000000e+00 : f32
    %7 = vector.broadcast %cst_5 : f32 to vector<16x128xf32>
    %8 = arith.maximumf %6, %7 : vector<16x128xf32>
    %9 = arith.truncf %8 : vector<16x128xf32> to vector<16x128xbf16>
    %c0_6 = arith.constant 0 : index
    %c0_7 = arith.constant 0 : index
    %10 = vector.load %arg4[%c0_6, %c0_7] : memref<128x128xbf16, #tpu.memory_space<vmem>>, vector<128x128xbf16>
    %cst_8 = arith.constant dense<0.000000e+00> : vector<16x128xf32>
    %11 = tpu.matmul %9, %10, %cst_8 {dimension_numbers = #tpu.dot_dimension_numbers<[1], [0], [0], [1], [0, 0, 1, 1], [], []>} : vector<16x128xbf16>, vector<128x128xbf16>, vector<16x128xf32> -> vector<16x128xf32>
    %c0_9 = arith.constant 0 : index
    %c0_10 = arith.constant 0 : index
    %12 = vector.load %arg5[%c0_9, %c0_10] : memref<1x128xf32, #tpu.memory_space<vmem>>, vector<1x128xf32>
    %13 = vector.broadcast %12 : vector<1x128xf32> to vector<16x128xf32>
    %14 = arith.addf %11, %13 : vector<16x128xf32>
    %cst_11 = arith.constant 0.000000e+00 : f32
    %15 = vector.broadcast %cst_11 : f32 to vector<16x128xf32>
    %16 = arith.maximumf %14, %15 : vector<16x128xf32>
    %c0_12 = arith.constant 0 : index
    %c0_13 = arith.constant 0 : index
    %17 = vector.load %arg6[%c0_12, %c0_13] : memref<1x128xbf16, #tpu.memory_space<vmem>>, vector<1x128xbf16>
    %18 = arith.extf %17 : vector<1x128xbf16> to vector<1x128xf32>
    %19 = vector.broadcast %18 : vector<1x128xf32> to vector<16x128xf32>
    %20 = arith.mulf %16, %19 : vector<16x128xf32>
    %cst_14 = arith.constant dense<0.000000e+00> : vector<16xf32>
    %21 = vector.multi_reduction <add>, %20, %cst_14 [1] : vector<16x128xf32> to vector<16xf32>
    %22 = vector.shape_cast %21 : vector<16xf32> to vector<16x1xf32>
    %c0_15 = arith.constant 0 : index
    %c0_16 = arith.constant 0 : index
    %23 = memref.load %arg7[%c0_15, %c0_16] : memref<1x1xf32, #tpu.memory_space<smem>>
    %24 = vector.broadcast %23 : f32 to vector<16x1xf32>
    %25 = arith.addf %22, %24 : vector<16x1xf32>
    %26 = arith.negf %25 : vector<16x1xf32>
    %27 = math.exp %26 : vector<16x1xf32>
    %cst_17 = arith.constant 1.000000e+00 : f32
    %28 = vector.broadcast %cst_17 : f32 to vector<16x1xf32>
    %29 = arith.addf %28, %27 : vector<16x1xf32>
    %30 = arith.divf %28, %29 : vector<16x1xf32>
    %c0_18 = arith.constant 0 : index
    %c0_19 = arith.constant 0 : index
    %31 = vector.load %arg8[%c0_18, %c0_19] : memref<16x1xf32, #tpu.memory_space<vmem>>, vector<16x1xf32>
    tpu.vector_store %arg8[%c0_18, %c0_19], %30 {strides = array<i32>} : memref<16x1xf32, #tpu.memory_space<vmem>>, vector<16x1xf32>,
    return
  }
  func.func @transform_0(%arg0: i32) -> (i32, i32) {
    %c0_i32 = arith.constant 0 : i32
    %c0_i32_0 = arith.constant 0 : i32
    return %arg0, %c0_i32 : i32, i32
  }
  func.func @transform_1(%arg0: i32) -> (i32, i32) {
    %c0_i32 = arith.constant 0 : i32
    %c0_i32_0 = arith.constant 0 : i32
    %c0_i32_1 = arith.constant 0 : i32
    return %c0_i32, %c0_i32_0 : i32, i32
  }
  func.func @transform_2(%arg0: i32) -> (i32, i32) {
    %c0_i32 = arith.constant 0 : i32
    %c0_i32_0 = arith.constant 0 : i32
    %c0_i32_1 = arith.constant 0 : i32
    return %c0_i32, %c0_i32_0 : i32, i32
  }
  func.func @transform_3(%arg0: i32) -> (i32, i32) {
    %c0_i32 = arith.constant 0 : i32
    %c0_i32_0 = arith.constant 0 : i32
    %c0_i32_1 = arith.constant 0 : i32
    return %c0_i32, %c0_i32_0 : i32, i32
  }
  func.func @transform_4(%arg0: i32) -> (i32, i32) {
    %c0_i32 = arith.constant 0 : i32
    %c0_i32_0 = arith.constant 0 : i32
    %c0_i32_1 = arith.constant 0 : i32
    return %c0_i32, %c0_i32_0 : i32, i32
  }
  func.func @transform_5(%arg0: i32) -> (i32, i32) {
    %c0_i32 = arith.constant 0 : i32
    %c0_i32_0 = arith.constant 0 : i32
    %c0_i32_1 = arith.constant 0 : i32
    return %c0_i32, %c0_i32_0 : i32, i32
  }
  func.func @transform_6(%arg0: i32) -> (i32, i32) {
    %c0_i32 = arith.constant 0 : i32
    %c0_i32_0 = arith.constant 0 : i32
    %c0_i32_1 = arith.constant 0 : i32
    return %c0_i32, %c0_i32_0 : i32, i32
  }
  func.func @transform_7(%arg0: i32) -> (i32, i32) {
    %c0_i32 = arith.constant 0 : i32
    %c0_i32_0 = arith.constant 0 : i32
    return %arg0, %c0_i32 : i32, i32
  }
}

</mosaic_0001>

<bundles_post_ra>
// kernel: patient_classification_net.1
= control target key start
LH: loop header
LB: loop body
LE: loop exit
PB: predicated region body
PF: predicated region fallthrough
CT: control target
= control target key end

     0   :  { %13 = vsyncpa [#allocation4], 0  ;;  %s503_s0 = inlined_call_operand.hbm [shape: f32[10,16], index: 0, kind: input, shape index: {}]   ;;  %s504_s1 = inlined_call_operand.hbm [shape: bf16[16,128], index: 1, kind: input, shape index: {}]   ;;  %s505_s2 = inlined_call_operand.vmem [shape: f32[1,128], index: 2, kind: input, shape index: {}]   ;;  %s506_s3 = inlined_call_operand.hbm [shape: bf16[128,128], index: 3, kind: input, shape index: {}]   ;;  %s507_s4 = inlined_call_operand.vmem [shape: f32[1,128], index: 4, kind: input, shape index: {}]   ;;  %s508_s5 = inlined_call_operand.vmem [shape: bf16[1,128], index: 5, kind: input, shape index: {}]   ;;  %s509_s6 = inlined_call_operand.<no memory space> [shape: f32[1,1], index: 6, kind: input, shape index: {}]   ;;  %s510_s7 = inlined_call_operand.vmem [shape: f32[10,1], index: 7, kind: output, shape index: {}]  }
   0x1   :  { %14 = vsyncpa [#allocation6], 0  ;;  %s427_s24 = smov [#allocation5]  }
   0x2   :  { %s32_s25 = sshll.u32 %s427_s24, 4  ;;  %s33_s25 = int_to_ptr.vmem [resolvable:$true] %s32_s25 }
   0x3   :  { %s371_s26 = scalar_lea.vmem %s33_s25, 128  ;;  %p376_p1 = scmp.lt.s32.totalorder %s33_s25, %s33_s25 }
   0x4   :  { %p372_p0 = scmp.ne.s32.totalorder %s33_s25, %s371_s26  ;;  %p377_p2 = scmp.lt.s32.totalorder %s371_s26, %s371_s26 }
   0x6   :  { %p378_p3 = por %p377_p2, %p376_p1 }
   0x8   :  { %p379_p4 = pnand %p378_p3, %p372_p0 }
   0xa   :  { %382 = shalt.err (!%p379_p4)
}
   0xb   :  { %s428_s27 = smov 64   ;;  %s429_s28 = smov 4  }
   0xc   :  { %38 = dma.hbm_to_vmem [thread:$0]  %s504_s1, 128, %s33_s25, [#allocation6], %s428_s27, %s428_s27, %s429_s28  }
   0xd   :  { %s430_s8 = smov [#allocation3]  }
   0xe   :  { %s20_s9 = sshll.u32 %s430_s8, 4  ;;  %s21_s9 = int_to_ptr.vmem [resolvable:$true] %s20_s9 }
   0xf   :  { %s391_s10 = scalar_lea.vmem %s21_s9, 256  ;;  %p396_p6 = scmp.lt.s32.totalorder %s21_s9, %s21_s9 }
  0x10   :  { %p392_p5 = scmp.ne.s32.totalorder %s21_s9, %s391_s10  ;;  %p397_p7 = scmp.lt.s32.totalorder %s391_s10, %s391_s10 }
  0x12   :  { %p398_p8 = por %p397_p7, %p396_p6 }
  0x14   :  { %p399_p9 = pnand %p398_p8, %p392_p5 }
  0x16   :  { %402 = shalt.err (!%p399_p9)
}
  0x17   :  { %s431_s11 = smov 128   ;;  %s432_s12 = smov 8  }
  0x18   :  { %26 = dma.hbm_to_vmem [thread:$0]  %s503_s0, 256, %s21_s9, [#allocation4], %s431_s11, %s431_s11, %s432_s12  }
  0x19   :  { %s433_s15 = smov [#allocation7]  }
  0x1a   :  { %s46_s16 = sshll.u32 %s433_s15, 4  ;;  %s47_s16 = int_to_ptr.vmem [resolvable:$true] %s46_s16 }
  0x1b   :  { %s411_s1 = scalar_lea.vmem %s47_s16, 1024  ;;  %p416_p11 = scmp.lt.s32.totalorder %s47_s16, %s47_s16 }
  0x1c   :  { %p412_p10 = scmp.ne.s32.totalorder %s47_s16, %s411_s1  ;;  %p417_p12 = scmp.lt.s32.totalorder %s411_s1, %s411_s1 }
  0x1e   :  { %p418_p13 = por %p417_p12, %p416_p11 }
  0x20   :  { %p419_p0 = pnand %p418_p13, %p412_p10 }
  0x22   :  { %422 = shalt.err (!%p419_p0)
}
  0x23   :  { %52 = dma.hbm_to_vmem [thread:$0]  %s506_s3, 1024, %s47_s16, [#allocation6], %s428_s27, %s428_s27, %s429_s28  }
  0x24   :  { %423 = dma.done.wait [#allocation4], 256  }
  0x25   :  { %424 = vsyncadd [#allocation4], 4294967040 }
  0x26   :  { %425 = dma.done.wait [#allocation6], 1152  }
  0x27   :  { %426 = vsyncadd [#allocation6], 4294966144  ;;  %v434_v0 = vmov 0.0   ;;  %vm435_vm0 = vmmov 0   ;;  %v346_v1 = vld [vmem:[#allocation5] sm:$0xff]   ;;  %v69_v2 = vld [vmem:[#allocation3] sm:$0xff]  ;;  %v251_v23 = vlaneseq  ;;  %v262_v40 = vstv %s509_s6 }
  0x28   :  { %311 = vmatprep.subr.bf16.mxu0 %v434_v0  ;;  %313 = vmatprep.mubr.msk.bf16.mxu0 %vm435_vm0, %v434_v0  ;;  %v70_v3 = vld [vmem:[#allocation3 + $0x8] sm:$0xff]  ;;  %vm87_vm1 = vcmask 130048   ;;  %v347_v5 = vld [vmem:[#allocation7 + $0x38] sm:$0xff]   ;;  %v349_v7 = vld [vmem:[#allocation7 + $0x28] sm:$0xff]   ;;  %vm277_vm2 = vcmask 7168  }
  0x29   :  { %317 = vmatprep.subr.bf16.mxu1 %v434_v0  ;;  %333 = vmatprep.mubr.msk.bf16.mxu1 %vm435_vm0, %v434_v0  ;;  %v71_v4 = vpack.c.bf16 %v70_v3, %v69_v2  ;;  %v348_v6 = vld [vmem:[#allocation7 + $0x30] sm:$0xff]   ;;  %v350_v8 = vld [vmem:[#allocation7 + $0x20] sm:$0xff]   ;;  %v351_v9 = vld [vmem:[#allocation7 + $0x18] sm:$0xff]   ;;  %v252_v24 = vshrl.u32 %v251_v23, 7 }
  0x2a   :  { %312 = vmatpush3.bf16.msra.mxu0 %v346_v1  ;;  %318 = vmatpush3.bf16.msra.mxu1 %v347_v5  ;;  %v352_v10 = vld [vmem:[#allocation7 + $0x10] sm:$0xff]   ;;  %v353_v11 = vld [vmem:[#allocation7 + $0x8] sm:$0xff]   ;;  %v354_v12 = vld [vmem:[#allocation7] sm:$0xff]  }
  0x2b   :  { %319 = vmatprep.subr.bf16.mxu1 %v434_v0  ;;  %v286_v13 = vld [vmem:[%s505_s2] ss:$0 sm:$0xff]  ;;  %v253_v27 = vsub.s32 0, %v252_v24 }
  0x2c   :  { %v249_v25 = vld [vmem:[%s508_s5] sm:$0x1] }
  0x2d   :  { %314 = vmatmul.mubr.msk.bf16.vlgmr.msra.gmra.mxu0 %vm87_vm1, %v71_v4  ;;  %v250_v26 = vunpack.c.l.bf16 %v249_v25  ;;  %v289_v28 = vld [vmem:[%s507_s4] ss:$0 sm:$0xff] }
  0x2e   :  { %320 = vmatpush3.bf16.msra.mxu1 %v348_v6 }
  0x2f   :  { %321 = vmatprep.subr.bf16.mxu1 %v434_v0  ;;  %v254_v31 = vrot.slane %v250_v26, %v253_v27 }
  0x32   :  { %322 = vmatpush3.bf16.msra.mxu1 %v349_v7 }
  0x33   :  { %323 = vmatprep.subr.bf16.mxu1 %v434_v0 }
  0x36   :  { %324 = vmatpush3.bf16.msra.mxu1 %v350_v8 }
  0x37   :  { %325 = vmatprep.subr.bf16.mxu1 %v434_v0 }
  0x3a   :  { %326 = vmatpush3.bf16.msra.mxu1 %v351_v9 }
  0x3b   :  { %327 = vmatprep.subr.bf16.mxu1 %v434_v0 }
  0x3e   :  { %328 = vmatpush3.bf16.msra.mxu1 %v352_v10 }
  0x3f   :  { %329 = vmatprep.subr.bf16.mxu1 %v434_v0 }
  0x42   :  { %330 = vmatpush3.bf16.msra.mxu1 %v353_v11 }
  0x43   :  { %331 = vmatprep.subr.bf16.mxu1 %v434_v0 }
  0x46   :  { %332 = vmatpush3.bf16.msra.mxu1 %v354_v12 }
  0xed   :  { %v125_v14 = vpop.f32.mrf.mxu0 }
  0xee   :  { %v126_v16 = vadd.f32 %v286_v13, %v125_v14 }
  0xef   :  { %v315_v15 = vpop.f32.mrf.mxu0 }
  0xf0   :  { %v132_v20 = vmax.f32 %v126_v16, 0.0 }
  0xf1   :  { %v128_v17 = vpop.f32.mrf.mxu0 }
  0xf2   :  { %v129_v18 = vadd.f32 %v286_v13, %v128_v17 }
  0xf3   :  { %v316_v19 = vpop.f32.mrf.mxu0 }
  0xf4   :  { %v133_v21 = vmax.f32 %v129_v18, 0.0 }
  0xf6   :  { %v134_v22 = vpack.c.bf16 %v133_v21, %v132_v20 }
  0xf8   :  { %334 = vmatmul.mubr.bf16.vlgmr.msra.gmra.mxu1 %v134_v22 }
 0x1b8   :  { %v240_v29 = vpop.f32.mrf.mxu1 }
 0x1b9   :  { %v241_v30 = vadd.f32 %v289_v28, %v240_v29 }
 0x1ba   :  { %v335_v32 = vpop.f32.mrf.mxu1 }
 0x1bb   :  { %v247_v33 = vmax.f32 %v241_v30, 0.0 }
 0x1bc   :  { %v243_v34 = vpop.f32.mrf.mxu1 }
 0x1bd   :  { %v244_v35 = vadd.f32 %v289_v28, %v243_v34  ;;  %v255_v36 = vmul.f32 %v254_v31, %v247_v33 }
 0x1be   :  { %v336_v37 = vpop.f32.mrf.mxu1 }
 0x1bf   :  { %v248_v38 = vmax.f32 %v244_v35, 0.0  ;;  %257 = vadd.xlane.f32.xlu0 %v255_v36 }
 0x1c1   :  { %v256_v39 = vmul.f32 %v254_v31, %v248_v38 }
 0x1c3   :  { %259 = vadd.xlane.f32.xlu0 %v256_v39 }
 0x248   :  { %v258_v41 = vpop.xlane.xlu0 %257 }
 0x249   :  { %v263_v42 = vadd.f32 %v262_v40, %v258_v41 }
 0x24b   :  { %v298_v43 = vmul.f32 -1.442695, %v263_v42 }
 0x24c   :  { %v260_v44 = vpop.xlane.xlu0 %259 }
 0x24d   :  { %355 = vpow2.f32 %v298_v43  ;;  %v264_v45 = vadd.f32 %v262_v40, %v260_v44 }
 0x24f   :  { %v299_v46 = vmul.f32 -1.442695, %v264_v45 }
 0x251   :  { %357 = vpow2.f32 %v299_v46 }
 0x25a   :  { %v356_v47 = vpop.eup %355 }
 0x25b   :  { %v271_v48 = vadd.f32 1.0, %v356_v47 }
 0x25d   :  { %359 = vrcp.f32 %v271_v48 }
 0x25e   :  { %v358_v49 = vpop.eup %357 }
 0x25f   :  { %v272_v50 = vadd.f32 1.0, %v358_v49 }
 0x261   :  { %361 = vrcp.f32 %v272_v50 }
 0x26a   :  { %v360_v51 = vpop.eup %359 }
 0x26b   :  { %278 = vst.msk [vmem:[%s510_s7] sm:$0xff] %vm277_vm2, %v360_v51 }
 0x26e   :  { %v362_v52 = vpop.eup %361 }
 0x26f   :  { %279 = vst.msk [vmem:[%s510_s7 + $0x8] sm:$0xff] %vm277_vm2, %v362_v52 }
 0x270   :  { %284 = vsyncpa [#allocation4], 1 }
 0x271   :  { %285 = vsyncpa [#allocation6], 1 }

</bundles_post_ra>
